<compile_context>
chip_gen: v5e
topology: v5e:2x2
jax: 0.10.0
libtpu: 0.0.40
codegen_flags: <defaults>
</compile_context>

<pallas_src>
import functools
import math

import jax
import jax.numpy as jnp
from jax.experimental import pallas as pl
from jax.experimental.pallas import tpu as pltpu


# Per-block byte target for the x tile (out tile is the same size, pe tile is at most
# the same).  With default double buffering on (x, out, pe) peak live VMEM is ~6x this.
_TARGET_BLOCK_BYTES = 4 * 1024 * 1024
_LANE_WIDTH_CAP = 4096  # max fused lane width per block (multiple of 128)


def make_positional_encoding(d_model: int, max_seq_len: int) -> jnp.ndarray:
    """Sinusoidal table identical to the PyTorch __init__ (kept in float32)."""
    position = jnp.arange(max_seq_len, dtype=jnp.float32)[:, None]              # (S_max, 1)
    div_term = jnp.exp(
        jnp.arange(0, d_model, 2, dtype=jnp.float32) * (-math.log(10000.0) / d_model)
    )                                                                            # (ceil(D/2),)
    pe = jnp.zeros((max_seq_len, d_model), dtype=jnp.float32)
    pe = pe.at[:, 0::2].set(jnp.sin(position * div_term))
    pe = pe.at[:, 1::2].set(jnp.cos(position * div_term)[:, : d_model // 2])    # odd-D safe
    return pe[None, :, :]                                                        # (1, S_max, D)


def _pe_add_kernel(x_ref, pe_ref, o_ref):
    # pe block is either the same shape as the x block or (1, lanes); both broadcast.
    o_ref[...] = x_ref[...] + pe_ref[...]


def _round_up(a: int, b: int) -> int:
    return -(-a // b) * b


def _sublane_multiple(dtype) -> int:
    # Native VMEM tiling: (8,128) for 4-byte, (16,128) for 2-byte, (32,128) for 1-byte.
    return max(8, 32 // jnp.dtype(dtype).itemsize)


def _divisors(n: int):
    out = set()
    i = 1
    while i * i <= n:
        if n % i == 0:
            out.add(i)
            out.add(n // i)
        i += 1
    return sorted(out)


def _choose_lane_width(n: int) -> int:
    """Largest multiple of 128 that divides n and is <= _LANE_WIDTH_CAP."""
    m = n // 128
    best = 1
    for d in range(1, min(m, _LANE_WIDTH_CAP // 128) + 1):
        if m % d == 0:
            best = d
    return 128 * best


@functools.partial(jax.jit, static_argnames=("donate_x",))
def positional_encoding_forward(x: jnp.ndarray, pe: jnp.ndarray, donate_x: bool = False):
    """out = x + pe[:, :S].  x: (B, S, D); pe: (1, S_max, D) with S <= S_max."""
    b, s, d = x.shape
    _, s_max, d_pe = pe.shape
    if d_pe != d:
        raise ValueError(f"d_model mismatch: x has {d}, pe has {d_pe}")
    if s > s_max:
        raise ValueError(f"sequence length {s} exceeds pe table length {s_max}")

    pe = pe[:, :s, :].astype(x.dtype)  # tiny; output dtype follows x (documented deviation)
    n = s * d
    itemsize = jnp.dtype(x.dtype).itemsize
    sub = _sublane_multiple(x.dtype)

    plan = None
    if n % 128 == 0:
        # Lane-dense view: fold (S, D) into rows of width c (multiple of 128 dividing S*D).
        c = _choose_lane_width(n)
        r = n // c                       # rows per batch sample == pe period (in rows)
        rows = b * r
        budget_rows = max(1, _TARGET_BLOCK_BYTES // (c * itemsize))
        base = math.lcm(r, sub)          # whole pe periods AND whole native sublane tiles

        if rows < base and rows * c * itemsize <= 2 * _TARGET_BLOCK_BYTES:
            # Tiny problem: fewer rows than one aligned unit -> one block covers it all.
            plan = ("B", c, r, rows, rows, b)
        elif base <= budget_rows and rows >= base:
            # Regime B: each block holds k whole pe periods; pe is pre-tiled into ONE
            # constant block whose DMA is issued once for the whole grid.
            k = max(1, min(budget_rows, rows) // base)
            if -(-rows // (k * base)) < 2:          # keep >= 2 blocks for v7x megacore
                k = max(1, (-(-rows // base)) // 2)
            tr = k * base
            plan = ("B", c, r, rows, tr, tr // r)
        else:
            # Regime A: block rows are an 8/sub-aligned divisor of the pe period r; the
            # pe BlockSpec index only depends on the outer "phase" axis, so pe is
            # streamed exactly once while the inner axis walks the batch.
            cap = min(r, max(sub, (budget_rows // sub) * sub))
            divs = _divisors(r)
            pref = [t for t in divs if t <= cap and t % sub == 0]
            ok = [t for t in divs if t <= cap and t % 8 == 0]
            tr = max(pref) if pref else (max(ok) if ok else 0)
            if tr:
                phases = r // tr
                if phases * b < 2:                  # v7x megacore: prefer >= 2 blocks
                    smaller = [t for t in (pref or ok) if t <= r // 2]
                    if smaller:
                        tr = max(smaller)
                        phases = r // tr
                plan = ("A", c, r, rows, tr, phases)
            # else: no 8-aligned divisor within budget -> generic fallback below.

    if plan is not None:
        kind, c, r, rows, tr, extra = plan
        x_op = x.reshape(rows, c)                   # bitcast under jit
        if kind == "B":
            reps = extra
            pe_op = jnp.tile(pe.reshape(r, c), (reps, 1))    # (tr, c): one constant block
            grid = (1, pl.cdiv(rows, tr))
            x_index = lambda p, i: (i, 0)
            pe_index = lambda p, i: (0, 0)
        else:
            phases = extra
            pe_op = pe.reshape(r, c)
            grid = (phases, b)                                # phase outer, batch inner
            x_index = lambda p, i: (i * phases + p, 0)
            pe_index = lambda p, i: (p, 0)
        in_specs = [pl.BlockSpec((tr, c), x_index),
                    pl.BlockSpec((tr, c), pe_index)]
        out_spec = pl.BlockSpec((tr, c), x_index)
        out_shape2 = jax.ShapeDtypeStruct((rows, c), x.dtype)
        blk = _round_up(tr, sub) * c * itemsize               # padded VMEM footprint
        vmem_needed = 2 * 3 * blk                             # double-buffered x/out/pe
    else:
        # Generic fallback (S*D not a multiple of 128, or pathological row factorization):
        # (B, S*D) view, x tiles (tb, tc), pe tile (1, tc) broadcast inside the kernel.
        x_op = x.reshape(b, n)
        pe_op = pe.reshape(1, n)
        tb = b if b <= sub else min((b // sub) * sub, 256)
        tc_cap = (n // 128) * 128
        if n <= 512 or tc_cap == 0:
            tc = n
        else:
            tc_budget = (_TARGET_BLOCK_BYTES // (max(tb, sub) * itemsize)) // 128 * 128
            tc = max(128, min(tc_budget, tc_cap))
        grid = (pl.cdiv(n, tc), pl.cdiv(b, tb))               # lane outer, batch inner
        in_specs = [pl.BlockSpec((tb, tc), lambda j, i: (i, j)),
                    pl.BlockSpec((1, tc), lambda j, i: (0, j))]
        out_spec = pl.BlockSpec((tb, tc), lambda j, i: (i, j))
        out_shape2 = jax.ShapeDtypeStruct((b, n), x.dtype)
        blk = _round_up(tb, sub) * _round_up(tc, 128) * itemsize
        pe_blk = _round_up(1, sub) * _round_up(tc, 128) * itemsize
        vmem_needed = 2 * (2 * blk + pe_blk)

    # Explicit scoped-VMEM request from the *padded* footprint (+ headroom), clamped so it
    # stays safely inside v7x's 64 MiB physical VMEM (and well under v5e/v6e's 128 MiB).
    vmem_limit = int(min(max(vmem_needed + (4 << 20), 16 << 20), 48 << 20))

    out2 = pl.pallas_call(
        _pe_add_kernel,
        out_shape=out_shape2,
        grid_spec=pltpu.PrefetchScalarGridSpec(
            num_scalar_prefetch=0,
            grid=grid,
            in_specs=in_specs,
            out_specs=out_spec,
        ),
        compiler_params=pltpu.CompilerParams(
            dimension_semantics=("parallel", "parallel"),
            vmem_limit_bytes=vmem_limit,
        ),
        input_output_aliases=({0: 0} if donate_x else {}),
    )(x_op, pe_op)

    return out2.reshape(b, s, d)


if __name__ == "__main__":
    # Small shapes consistent with the module: batch=2, seq=8, d_model=32.
    d_model = 32
    max_seq_len = 16
    batch = 2
    seq = 8

    key = jax.random.PRNGKey(0)
    x = jax.random.normal(key, (batch, seq, d_model), dtype=jnp.float32)
    pe = make_positional_encoding(d_model, max_seq_len)

    out = positional_encoding_forward(x, pe)
    out = jax.block_until_ready(out)

    # Reference check (pure JAX, mirrors the PyTorch forward exactly).
    ref = x + pe[:, :seq].astype(x.dtype)
    assert out.shape == x.shape
    assert jnp.allclose(out, ref, atol=1e-6), "mismatch vs reference"

    print("KERNEL_OK")
</pallas_src>

<mosaic_0001>
module attributes {stable_mosaic.version = 11 : i64} {
  func.func @_pe_add_kernel(%arg0: i32, %arg1: i32, %arg2: memref<2x256xf32, #tpu.memory_space<vmem>>, %arg3: memref<2x256xf32, #tpu.memory_space<vmem>>, %arg4: memref<2x256xf32, #tpu.memory_space<vmem>>) attributes {dimension_semantics = [#tpu.dimension_semantics<parallel>, #tpu.dimension_semantics<parallel>], iteration_bounds = array<i64: 1, 1>, scalar_prefetch = 0 : i64, scratch_operands = 0 : i64, tpu.core_type = #tpu.core_type<tc>, window_params = [{transform_indices = @transform_0, window_bounds = array<i64: 2, 256>}, {pipeline_mode = #tpu.pipeline_mode<synchronous>, transform_indices = @transform_1, window_bounds = array<i64: 2, 256>}, {transform_indices = @transform_2, window_bounds = array<i64: 2, 256>}]} {
    %c0 = arith.constant 0 : index
    %c0_0 = arith.constant 0 : index
    %0 = vector.load %arg2[%c0, %c0_0] : memref<2x256xf32, #tpu.memory_space<vmem>>, vector<2x256xf32>
    %c0_1 = arith.constant 0 : index
    %c0_2 = arith.constant 0 : index
    %1 = vector.load %arg3[%c0_1, %c0_2] : memref<2x256xf32, #tpu.memory_space<vmem>>, vector<2x256xf32>
    %2 = arith.addf %0, %1 : vector<2x256xf32>
    %c0_3 = arith.constant 0 : index
    %c0_4 = arith.constant 0 : index
    %3 = vector.load %arg4[%c0_3, %c0_4] : memref<2x256xf32, #tpu.memory_space<vmem>>, vector<2x256xf32>
    tpu.vector_store %arg4[%c0_3, %c0_4], %2 {strides = array<i32>} : memref<2x256xf32, #tpu.memory_space<vmem>>, vector<2x256xf32>,
    return
  }
  func.func @transform_0(%arg0: i32, %arg1: i32) -> (i32, i32) {
    %c0_i32 = arith.constant 0 : i32
    %c0_i32_0 = arith.constant 0 : i32
    return %arg1, %c0_i32 : i32, i32
  }
  func.func @transform_1(%arg0: i32, %arg1: i32) -> (i32, i32) {
    %c0_i32 = arith.constant 0 : i32
    %c0_i32_0 = arith.constant 0 : i32
    %c0_i32_1 = arith.constant 0 : i32
    return %c0_i32, %c0_i32_0 : i32, i32
  }
  func.func @transform_2(%arg0: i32, %arg1: i32) -> (i32, i32) {
    %c0_i32 = arith.constant 0 : i32
    %c0_i32_0 = arith.constant 0 : i32
    return %arg1, %c0_i32 : i32, i32
  }
}

</mosaic_0001>

<bundles_post_ra>
// kernel: positional_encoding_forward.1
= control target key start
LH: loop header
LB: loop body
LE: loop exit
PB: predicated region body
PF: predicated region fallthrough
CT: control target
= control target key end

     0   :  { %s43_s0 = inlined_call_operand.vmem [shape: f32[2,256], index: 0, kind: input, shape index: {}]   ;;  %s44_s1 = inlined_call_operand.vmem [shape: f32[2,256], index: 1, kind: input, shape index: {}]   ;;  %s45_s2 = inlined_call_operand.vmem [shape: f32[2,256], index: 2, kind: output, shape index: {}]  }
   0x1   :  { %v11_v0 = vld [vmem:[%s43_s0] sm:$0xf] }
   0x2   :  { %v12_v1 = vld [vmem:[%s44_s1] sm:$0xf] }
   0x3   :  { %v13_v2 = vadd.f32 %v12_v1, %v11_v0 }
   0x5   :  { %14 = vst [vmem:[%s45_s2] sm:$0xf] %v13_v2 }

</bundles_post_ra>
